<compile_context>
chip_gen: v5e
topology: v5e:2x2
jax: 0.10.0
libtpu: 0.0.40
codegen_flags: <defaults>
</compile_context>

<pallas_src>
import functools

import jax
import jax.numpy as jnp
from jax import lax
from jax.experimental import pallas as pl
from jax.experimental.pallas import tpu as pltpu

ROOT_TOKEN = "<root>"
END_TOKEN = "<end>"
NEG_INF = -10000.0


def _crf_kernel(feats_ref, tags_ref, mask_ref, trans3_ref, trans_end_ref,
                nll_ref, bp_ref, best_tag_ref, path_score_ref,
                fv_ref, gold_ref, oh_prev_ref, oh_last_ref, vit_ref, term_ref,
                *, root_idx, total_t):
    t_grid = pl.program_id(1)
    n_tgrid = pl.num_programs(1)
    t_tile, n_tags, bt = feats_ref.shape           # (Tt, N, Bt), batch on lanes

    # ---- hoisted, loop-invariant constants (once per grid invocation) ----
    trans3 = trans3_ref[...].astype(jnp.float32)        # (Nprev, Ncur, 1)
    trans_root = trans3[root_idx]                       # (Ncur, 1)  row <root>
    trans_end = trans_end_ref[...].astype(jnp.float32)  # (N, 1)     col <end>
    iota_tag = lax.broadcasted_iota(jnp.int32, (n_tags, bt), 0)            # (N, Bt)
    iota_prev = lax.broadcasted_iota(jnp.int32, (n_tags, n_tags, bt), 0)   # (Np, Nc, Bt)
    init_vvars = jnp.where(iota_tag == root_idx, 0.0, NEG_INF).astype(jnp.float32)

    # ---- per-batch-tile state init (first time tile only) ----
    @pl.when(t_grid == 0)
    def _init():
        fv_ref[...] = jnp.zeros_like(fv_ref)
        gold_ref[...] = jnp.zeros_like(gold_ref)
        oh_prev_ref[...] = jnp.zeros_like(oh_prev_ref)
        oh_last_ref[...] = jnp.zeros_like(oh_last_ref)
        vit_ref[...] = init_vvars
        term_ref[...] = init_vvars

    # ---- fused time recurrence: forward alg + gold score + Viterbi ----
    @pl.loop(0, t_tile)
    def _step(lt):
        gt = t_grid * t_tile + lt                         # global time index
        is_first = (gt == 0).astype(jnp.float32)
        want_emis = (gt < (total_t - 1)).astype(jnp.float32)

        emit = feats_ref[lt].astype(jnp.float32)          # (N, Bt)
        tag_row = tags_ref[lt]                            # (1, Bt) int32
        m_t = mask_ref[lt].astype(jnp.float32)            # (1, Bt)
        oh_t = (iota_tag == tag_row).astype(jnp.float32)  # (N, Bt)

        # (1) forward algorithm (log-partition recurrence)
        fv_prev = fv_ref[...]
        nv = fv_prev[:, None, :] + emit[None, :, :] + trans3     # (Np, Nc, Bt)
        mmax = jnp.max(nv, axis=0)                               # (N, Bt)
        lse = jnp.log(jnp.sum(jnp.exp(nv - mmax[None]), axis=0)) + mmax
        fv_step = lse * m_t + fv_prev * (1.0 - m_t)
        fv_init = trans_root + emit
        fv_ref[...] = is_first * fv_init + (1.0 - is_first) * fv_step

        # (2) gold-sequence score (pure-VPU contraction, no per-step MXU)
        oh_prev = oh_prev_ref[...]
        trans_into = jnp.sum(oh_prev[:, None, :] * trans3, axis=0)    # (Nc, Bt)
        tr_b = jnp.sum(trans_into * oh_t, axis=0, keepdims=True)      # (1, Bt)
        emis_b = jnp.sum(emit * oh_t, axis=0, keepdims=True)          # (1, Bt)
        init_b = jnp.sum(trans_root * oh_t, axis=0, keepdims=True)    # (1, Bt)
        gold_ref[...] = (gold_ref[...]
                         + is_first * init_b
                         + (1.0 - is_first) * tr_b * m_t
                         + want_emis * emis_b * m_t)
        oh_prev_ref[...] = oh_t
        oh_last_ref[...] = m_t * oh_t + (1.0 - m_t) * oh_last_ref[...]

        # (3) Viterbi forward: max-plus + first-argmax backpointers
        vit_prev = vit_ref[...]
        nvv = vit_prev[:, None, :] + trans3                      # (Np, Nc, Bt)
        mx = jnp.max(nvv, axis=0)                                # (N, Bt)
        bp_t = jnp.min(jnp.where(nvv == mx[None], iota_prev, n_tags - 1), axis=0)
        bp_ref[lt] = bp_t                                        # lane-dense store
        vit_new = mx + emit
        vit_ref[...] = vit_new
        # snapshot of forward_var at each sequence's last valid step
        term_ref[...] = m_t * vit_new + (1.0 - m_t) * term_ref[...]

    # ---- finalize at the last time tile ----
    @pl.when(t_grid == n_tgrid - 1)
    def _finalize():
        # log-partition
        alphas = fv_ref[...] + trans_end                         # (N, Bt)
        am = jnp.max(alphas, axis=0, keepdims=True)
        partition = jnp.log(jnp.sum(jnp.exp(alphas - am), axis=0, keepdims=True)) + am

        # gold score final terms (last transition + last emission)
        oh_last = oh_last_ref[...]
        feats_last = feats_ref[t_tile - 1].astype(jnp.float32)   # global step T-1
        mask_last = mask_ref[t_tile - 1].astype(jnp.float32)
        last_trans = jnp.sum(trans_end * oh_last, axis=0, keepdims=True)
        last_input = jnp.sum(feats_last * oh_last, axis=0, keepdims=True)
        gold = gold_ref[...] + last_trans + last_input * mask_last
        nll_ref[...] = partition - gold

        # Viterbi terminal (per-sequence best last tag + path score)
        terminal = term_ref[...] + trans_end
        pscore = jnp.max(terminal, axis=0, keepdims=True)
        best = jnp.min(jnp.where(terminal == pscore, iota_tag, n_tags - 1),
                       axis=0, keepdims=True)
        best_tag_ref[...] = best
        path_score_ref[...] = pscore


def chain_crf_pallas(feats, tags, mask, log_transitions, root_idx, end_idx,
                     *, block_b=None, block_t=None):
    """feats (B,T,N), tags/mask (B,T), log_transitions (N,N)."""
    B, T, N = feats.shape

    # batch tile: full batch for small B, otherwise a lane-dense 128 multiple.
    if block_b is None:
        block_b = 128 if (B % 128 == 0) else B
    assert B % block_b == 0 and (block_b == B or block_b % 128 == 0)

    # time tile: streams feats in / backpointers out tile-by-tile.
    # (For v7x, prefer the smaller tile: half the VMEM of v5e/v6e.)
    if block_t is None:
        block_t = T
        for cand in (64, 32, 16, 8, 4, 2, 1):
            if T % cand == 0:
                block_t = cand
                break
    assert T % block_t == 0
    nb, nt = B // block_b, T // block_t

    # lane-dense layout: batch on the 128-lane axis, tags on sublanes.
    feats_t = jnp.transpose(feats, (1, 2, 0))                              # (T, N, B)
    tags_t = jnp.transpose(tags.astype(jnp.int32), (1, 0))[:, None, :]     # (T, 1, B)
    mask_t = jnp.transpose(mask, (1, 0))[:, None, :]                       # (T, 1, B)
    lt32 = log_transitions.astype(jnp.float32)
    trans3 = lt32[:, :, None]                                              # (N, N, 1)
    trans_end_col = lt32[:, end_idx][:, None]                              # (N, 1)

    kernel = functools.partial(_crf_kernel, root_idx=root_idx, total_t=T)
    out_shape = (
        jax.ShapeDtypeStruct((1, B), jnp.float32),   # nll per sequence
        jax.ShapeDtypeStruct((T, N, B), jnp.int32),  # backpointers (lane-dense)
        jax.ShapeDtypeStruct((1, B), jnp.int32),     # best last tag
        jax.ShapeDtypeStruct((1, B), jnp.float32),   # viterbi path score
    )
    # TODO(synk): backpointers could be int8 (values < N) to cut writeback bytes
    # 4x; kept int32 for layout simplicity.
    grid_spec = pltpu.PrefetchScalarGridSpec(
        num_scalar_prefetch=0,
        grid=(nb, nt),
        in_specs=[
            pl.BlockSpec((block_t, N, block_b), lambda b, t: (t, 0, b)),
            pl.BlockSpec((block_t, 1, block_b), lambda b, t: (t, 0, b)),
            pl.BlockSpec((block_t, 1, block_b), lambda b, t: (t, 0, b)),
            pl.BlockSpec((N, N, 1), lambda b, t: (0, 0, 0)),
            pl.BlockSpec((N, 1), lambda b, t: (0, 0)),
        ],
        out_specs=[
            pl.BlockSpec((1, block_b), lambda b, t: (0, b)),
            pl.BlockSpec((block_t, N, block_b), lambda b, t: (t, 0, b)),
            pl.BlockSpec((1, block_b), lambda b, t: (0, b)),
            pl.BlockSpec((1, block_b), lambda b, t: (0, b)),
        ],
        scratch_shapes=[
            pltpu.VMEM((N, block_b), jnp.float32),   # forward log-alphas
            pltpu.VMEM((1, block_b), jnp.float32),   # gold score accumulator
            pltpu.VMEM((N, block_b), jnp.float32),   # previous-tag one-hot
            pltpu.VMEM((N, block_b), jnp.float32),   # last-valid-tag one-hot
            pltpu.VMEM((N, block_b), jnp.float32),   # viterbi forward vars
            pltpu.VMEM((N, block_b), jnp.float32),   # terminal snapshot
        ],
    )
    nll, bp, best_tag, pscore = pl.pallas_call(
        kernel,
        out_shape=out_shape,
        grid_spec=grid_spec,
        compiler_params=pltpu.CompilerParams(
            dimension_semantics=("parallel", "arbitrary")),
    )(feats_t, tags_t, mask_t, trans3, trans_end_col)
    return nll[0], bp, best_tag[0], pscore[0]


def viterbi_backtrace(bp_tnb, best_tag, lengths, end_idx):
    # Plain-JAX glue: O(T) data-dependent gathers (not a kernel hot path).
    T, N, B = bp_tnb.shape
    barange = jnp.arange(B)
    path = jnp.zeros((B, T + 2), jnp.int32)
    path = path.at[barange, lengths].set(best_tag)
    for t in range(T - 1, -1, -1):
        nxt = path[barange, t + 1]
        prev = bp_tnb[t, nxt, barange]
        upd = jnp.where(t <= lengths - 1, prev, path[:, t])
        path = path.at[:, t].set(upd)
    path = path.at[barange, lengths + 1].set(jnp.int32(end_idx))
    return path


class ChainCRFallenNLP:
    """JAX/Pallas port of the PyTorch ChainCRFallenNLP forward pass."""

    def __init__(self, n_tags, tag_to_ix, hidden_dim, key):
        self.tag_to_ix = tag_to_ix
        self.tagset_size = n_tags
        self.hidden_dim = hidden_dim
        # xavier_normal_(gain=1): std = sqrt(2 / (fan_in + fan_out))
        std = (2.0 / (n_tags + n_tags)) ** 0.5
        lt = std * jax.random.normal(key, (n_tags, n_tags), jnp.float32)
        lt = lt.at[:, tag_to_ix[ROOT_TOKEN]].set(NEG_INF)
        lt = lt.at[tag_to_ix[END_TOKEN], :].set(NEG_INF)
        self.log_transitions = lt

    def forward(self, lstm_feats, tags, mask, lengths, training=True,
                block_b=None, block_t=None):
        root_idx = self.tag_to_ix[ROOT_TOKEN]
        end_idx = self.tag_to_ix[END_TOKEN]
        nll, bp, best_tag, pscore = chain_crf_pallas(
            lstm_feats, tags, mask, self.log_transitions, root_idx, end_idx,
            block_b=block_b, block_t=block_t)
        # TODO(synk): the reference _viterbi_decode's counter-based reordering assumes
        # batch sorted by descending length; results here are in batch order
        # (equivalent under that assumption).
        tag_seq = viterbi_backtrace(bp, best_tag, lengths.astype(jnp.int32), end_idx)
        # mirrors the reference's torch.LongTensor(...) cast of the path scores
        score = pscore.astype(jnp.int32)
        loss = jnp.sum(nll) if training else None
        # TODO(synk): viterbi_tags() (per-example host-side loop) is unused by
        # forward() and is not implemented here.
        return loss, score, tag_seq


def _crf_reference(feats, tags, mask, trans, root_idx, end_idx, lengths):
    """Plain-JAX port of the PyTorch math, used only for validation."""
    B, T, N = feats.shape
    maskf = mask.astype(jnp.float32)
    ar = jnp.arange(B)
    # log partition
    fv = trans[root_idx, :][None, :] + feats[:, 0, :]
    for t in range(1, T):
        nv = fv[:, :, None] + feats[:, t, :][:, None, :] + trans[None, :, :]
        m = jnp.max(nv, axis=1)
        lse = jnp.log(jnp.sum(jnp.exp(nv - m[:, None, :]), axis=1)) + m
        mt = maskf[:, t][:, None]
        fv = lse * mt + fv * (1.0 - mt)
    alphas = fv + trans[:, end_idx][None, :]
    am = jnp.max(alphas, axis=1)
    partition = jnp.log(jnp.sum(jnp.exp(alphas - am[:, None]), axis=1)) + am
    # gold score
    scores = trans[root_idx, tags[:, 0]]
    for t in range(T - 1):
        scores = (scores + trans[tags[:, t], tags[:, t + 1]] * maskf[:, t + 1]
                  + feats[ar, t, tags[:, t]] * maskf[:, t])
    last_tags = tags[ar, lengths - 1]
    scores = scores + trans[last_tags, end_idx] + feats[ar, T - 1, last_tags] * maskf[:, T - 1]
    nll = partition - scores
    # viterbi terminal
    vit = jnp.where(jnp.arange(N)[None, :] == root_idx, 0.0, NEG_INF) * jnp.ones((B, 1))
    term = jnp.zeros((B, N), jnp.float32)
    for t in range(T):
        nv = vit[:, :, None] + trans[None, :, :]
        vit = jnp.max(nv, axis=1) + feats[:, t, :]
        sel = maskf[:, t][:, None]
        term = sel * vit + (1.0 - sel) * term
    terminal = term + trans[:, end_idx][None, :]
    return nll, jnp.max(terminal, axis=1), jnp.argmax(terminal, axis=1)


if __name__ == "__main__":
    key = jax.random.PRNGKey(0)
    k_trans, k_feats, k_tags = jax.random.split(key, 3)

    n_tags = 8                          # 6 real tags + ROOT + END
    tag_names = [f"tag{i}" for i in range(n_tags - 2)] + [ROOT_TOKEN, END_TOKEN]
    tag_to_ix = {t: i for i, t in enumerate(tag_names)}
    B, T, H = 4, 8, 32

    crf = ChainCRFallenNLP(n_tags, tag_to_ix, H, k_trans)
    root_idx = tag_to_ix[ROOT_TOKEN]
    end_idx = tag_to_ix[END_TOKEN]

    lstm_feats = jax.random.normal(k_feats, (B, T, n_tags), jnp.float32)
    tags = jax.random.randint(k_tags, (B, T), 0, n_tags - 2).astype(jnp.int32)
    lengths = jnp.array([8, 6, 5, 3], jnp.int32)   # sorted descending (reference assumption)
    mask = (jnp.arange(T)[None, :] < lengths[:, None]).astype(jnp.float32)

    # block_t=4 exercises the multi-time-tile streaming path (grid = (1, 2)).
    nll, bp, best_tag, pscore = chain_crf_pallas(
        lstm_feats, tags, mask, crf.log_transitions, root_idx, end_idx,
        block_b=B, block_t=4)
    loss, score, tag_seq = crf.forward(lstm_feats, tags, mask, lengths,
                                       training=True, block_b=B, block_t=4)
    (nll, bp, best_tag, pscore, loss, score, tag_seq) = jax.block_until_ready(
        (nll, bp, best_tag, pscore, loss, score, tag_seq))

    # validate the kernel against a plain-JAX port of the PyTorch math
    ref_nll, ref_pscore, ref_best = _crf_reference(
        lstm_feats, tags, mask, crf.log_transitions, root_idx, end_idx, lengths)
    assert jnp.allclose(nll, ref_nll, rtol=1e-4, atol=1e-3)
    assert jnp.allclose(pscore, ref_pscore, rtol=1e-4, atol=1e-3)
    assert jnp.array_equal(best_tag, ref_best)
    assert bool(jnp.isfinite(loss))
    assert tag_seq.shape == (B, T + 2)
    # same invariant the reference asserts: every decoded path starts at ROOT
    assert int(jnp.sum(tag_seq[:, 0])) == B * root_idx
    print("KERNEL_OK")
</pallas_src>

<mosaic_0001>
module attributes {stable_mosaic.version = 11 : i64} {
  func.func @_crf_kernel(%arg0: i32, %arg1: i32, %arg2: memref<4x8x4xf32, #tpu.memory_space<vmem>>, %arg3: memref<4x1x4xi32, #tpu.memory_space<vmem>>, %arg4: memref<4x1x4xf32, #tpu.memory_space<vmem>>, %arg5: memref<8x8x1xf32, #tpu.memory_space<vmem>>, %arg6: memref<8x1xf32, #tpu.memory_space<vmem>>, %arg7: memref<1x4xf32, #tpu.memory_space<vmem>>, %arg8: memref<4x8x4xi32, #tpu.memory_space<vmem>>, %arg9: memref<1x4xi32, #tpu.memory_space<vmem>>, %arg10: memref<1x4xf32, #tpu.memory_space<vmem>>, %arg11: memref<8x4xf32, #tpu.memory_space<vmem>>, %arg12: memref<1x4xf32, #tpu.memory_space<vmem>>, %arg13: memref<8x4xf32, #tpu.memory_space<vmem>>, %arg14: memref<8x4xf32, #tpu.memory_space<vmem>>, %arg15: memref<8x4xf32, #tpu.memory_space<vmem>>, %arg16: memref<8x4xf32, #tpu.memory_space<vmem>>) attributes {dimension_semantics = [#tpu.dimension_semantics<parallel>, #tpu.dimension_semantics<arbitrary>], iteration_bounds = array<i64: 1, 2>, scalar_prefetch = 0 : i64, scratch_operands = 6 : i64, tpu.core_type = #tpu.core_type<tc>, window_params = [{transform_indices = @transform_0, window_bounds = array<i64: 4, 8, 4>}, {transform_indices = @transform_1, window_bounds = array<i64: 4, 1, 4>}, {transform_indices = @transform_2, window_bounds = array<i64: 4, 1, 4>}, {pipeline_mode = #tpu.pipeline_mode<synchronous>, transform_indices = @transform_3, window_bounds = array<i64: 8, 8, 1>}, {pipeline_mode = #tpu.pipeline_mode<synchronous>, transform_indices = @transform_4, window_bounds = array<i64: 8, 1>}, {transform_indices = @transform_5, window_bounds = array<i64: 1, 4>}, {transform_indices = @transform_6, window_bounds = array<i64: 4, 8, 4>}, {transform_indices = @transform_7, window_bounds = array<i64: 1, 4>}, {transform_indices = @transform_8, window_bounds = array<i64: 1, 4>}]} {
    %c0 = arith.constant 0 : index
    %c0_0 = arith.constant 0 : index
    %c0_1 = arith.constant 0 : index
    %0 = vector.load %arg5[%c0, %c0_0, %c0_1] : memref<8x8x1xf32, #tpu.memory_space<vmem>>, vector<8x8x1xf32>
    %1 = vector.extract_strided_slice %0 {offsets = [6, 0, 0], sizes = [1, 8, 1], strides = [1, 1, 1]} : vector<8x8x1xf32> to vector<1x8x1xf32>
    %2 = vector.shape_cast %1 : vector<1x8x1xf32> to vector<8x1xf32>
    %c0_2 = arith.constant 0 : index
    %c0_3 = arith.constant 0 : index
    %3 = vector.load %arg6[%c0_2, %c0_3] : memref<8x1xf32, #tpu.memory_space<vmem>>, vector<8x1xf32>
    %4 = tpu.iota {dimensions = array<i32: 0>} : vector<8x4xi32>
    %5 = tpu.iota {dimensions = array<i32: 0>} : vector<8x8x4xi32>
    %c6_i32 = arith.constant 6 : i32
    %6 = vector.broadcast %c6_i32 : i32 to vector<8x4xi32>
    %7 = arith.cmpi eq, %4, %6 : vector<8x4xi32>
    %cst = arith.constant 0.000000e+00 : f32
    %cst_4 = arith.constant -1.000000e+04 : f32
    %8 = vector.broadcast %cst : f32 to vector<8x4xf32>
    %9 = vector.broadcast %cst_4 : f32 to vector<8x4xf32>
    %10 = arith.select %7, %8, %9 : vector<8x4xi1>, vector<8x4xf32>
    %c0_i32 = arith.constant 0 : i32
    %11 = arith.cmpi eq, %arg1, %c0_i32 : i32
    %12 = arith.extui %11 : i1 to i32
    %c0_i32_5 = arith.constant 0 : i32
    %13 = arith.cmpi ne, %12, %c0_i32_5 : i32
    scf.if %13 {
      %cst_10 = arith.constant 0.000000e+00 : f32
      %18 = vector.broadcast %cst_10 : f32 to vector<8x4xf32>
      %c0_11 = arith.constant 0 : index
      %c0_12 = arith.constant 0 : index
      %19 = vector.load %arg11[%c0_11, %c0_12] : memref<8x4xf32, #tpu.memory_space<vmem>>, vector<8x4xf32>
      tpu.vector_store %arg11[%c0_11, %c0_12], %18 {strides = array<i32>} : memref<8x4xf32, #tpu.memory_space<vmem>>, vector<8x4xf32>,
      %cst_13 = arith.constant 0.000000e+00 : f32
      %20 = vector.broadcast %cst_13 : f32 to vector<1x4xf32>
      %c0_14 = arith.constant 0 : index
      %c0_15 = arith.constant 0 : index
      %21 = vector.load %arg12[%c0_14, %c0_15] : memref<1x4xf32, #tpu.memory_space<vmem>>, vector<1x4xf32>
      tpu.vector_store %arg12[%c0_14, %c0_15], %20 {strides = array<i32>} : memref<1x4xf32, #tpu.memory_space<vmem>>, vector<1x4xf32>,
      %cst_16 = arith.constant 0.000000e+00 : f32
      %22 = vector.broadcast %cst_16 : f32 to vector<8x4xf32>
      %c0_17 = arith.constant 0 : index
      %c0_18 = arith.constant 0 : index
      %23 = vector.load %arg13[%c0_17, %c0_18] : memref<8x4xf32, #tpu.memory_space<vmem>>, vector<8x4xf32>
      tpu.vector_store %arg13[%c0_17, %c0_18], %22 {strides = array<i32>} : memref<8x4xf32, #tpu.memory_space<vmem>>, vector<8x4xf32>,
      %cst_19 = arith.constant 0.000000e+00 : f32
      %24 = vector.broadcast %cst_19 : f32 to vector<8x4xf32>
      %c0_20 = arith.constant 0 : index
      %c0_21 = arith.constant 0 : index
      %25 = vector.load %arg14[%c0_20, %c0_21] : memref<8x4xf32, #tpu.memory_space<vmem>>, vector<8x4xf32>
      tpu.vector_store %arg14[%c0_20, %c0_21], %24 {strides = array<i32>} : memref<8x4xf32, #tpu.memory_space<vmem>>, vector<8x4xf32>,
      %c0_22 = arith.constant 0 : index
      %c0_23 = arith.constant 0 : index
      %26 = vector.load %arg15[%c0_22, %c0_23] : memref<8x4xf32, #tpu.memory_space<vmem>>, vector<8x4xf32>
      tpu.vector_store %arg15[%c0_22, %c0_23], %10 {strides = array<i32>} : memref<8x4xf32, #tpu.memory_space<vmem>>, vector<8x4xf32>,
      %c0_24 = arith.constant 0 : index
      %c0_25 = arith.constant 0 : index
      %27 = vector.load %arg16[%c0_24, %c0_25] : memref<8x4xf32, #tpu.memory_space<vmem>>, vector<8x4xf32>
      tpu.vector_store %arg16[%c0_24, %c0_25], %10 {strides = array<i32>} : memref<8x4xf32, #tpu.memory_space<vmem>>, vector<8x4xf32>,
    } else {
    }
    %c0_i32_6 = arith.constant 0 : i32
    %c4_i32 = arith.constant 4 : i32
    %14 = arith.addi %c0_i32_6, %c4_i32 : i32
    %c1_i32 = arith.constant 1 : i32
    scf.for %arg17 = %c0_i32_6 to %14 step %c1_i32  : i32 {
      %c1_i32_10 = arith.constant 1 : i32
      %18 = arith.muli %arg17, %c1_i32_10 : i32
      %c0_i32_11 = arith.constant 0 : i32
      %19 = arith.addi %c0_i32_11, %18 : i32
      %c4_i32_12 = arith.constant 4 : i32
      %20 = arith.muli %arg1, %c4_i32_12 : i32
      %21 = arith.addi %20, %19 : i32
      %c0_i32_13 = arith.constant 0 : i32
      %22 = arith.cmpi eq, %21, %c0_i32_13 : i32
      %23 = arith.extui %22 : i1 to i32
      %24 = arith.sitofp %23 : i32 to f32
      %c7_i32 = arith.constant 7 : i32
      %25 = arith.cmpi slt, %21, %c7_i32 : i32
      %26 = arith.extui %25 : i1 to i32
      %27 = arith.sitofp %26 : i32 to f32
      %28 = arith.index_cast %19 : i32 to index
      %c0_14 = arith.constant 0 : index
      %c0_15 = arith.constant 0 : index
      %29 = vector.load %arg2[%28, %c0_14, %c0_15] : memref<4x8x4xf32, #tpu.memory_space<vmem>>, vector<1x8x4xf32>
      %30 = vector.shape_cast %29 : vector<1x8x4xf32> to vector<8x4xf32>
      %31 = arith.index_cast %19 : i32 to index
      %c0_16 = arith.constant 0 : index
      %c0_17 = arith.constant 0 : index
      %32 = vector.load %arg3[%31, %c0_16, %c0_17] : memref<4x1x4xi32, #tpu.memory_space<vmem>>, vector<1x1x4xi32>
      %33 = vector.shape_cast %32 : vector<1x1x4xi32> to vector<1x4xi32>
      %34 = arith.index_cast %19 : i32 to index
      %c0_18 = arith.constant 0 : index
      %c0_19 = arith.constant 0 : index
      %35 = vector.load %arg4[%34, %c0_18, %c0_19] : memref<4x1x4xf32, #tpu.memory_space<vmem>>, vector<1x1x4xf32>
      %36 = vector.shape_cast %35 : vector<1x1x4xf32> to vector<1x4xf32>
      %37 = vector.broadcast %33 : vector<1x4xi32> to vector<8x4xi32>
      %38 = arith.cmpi eq, %4, %37 : vector<8x4xi32>
      %39 = arith.extui %38 : vector<8x4xi1> to vector<8x4xi32>
      %40 = arith.sitofp %39 : vector<8x4xi32> to vector<8x4xf32>
      %c0_20 = arith.constant 0 : index
      %c0_21 = arith.constant 0 : index
      %41 = vector.load %arg11[%c0_20, %c0_21] : memref<8x4xf32, #tpu.memory_space<vmem>>, vector<8x4xf32>
      %42 = vector.shape_cast %41 : vector<8x4xf32> to vector<8x1x4xf32>
      %43 = vector.shape_cast %30 : vector<8x4xf32> to vector<1x8x4xf32>
      %44 = vector.broadcast %42 : vector<8x1x4xf32> to vector<8x8x4xf32>
      %45 = vector.broadcast %43 : vector<1x8x4xf32> to vector<8x8x4xf32>
      %46 = arith.addf %44, %45 : vector<8x8x4xf32>
      %47 = vector.broadcast %0 : vector<8x8x1xf32> to vector<8x8x4xf32>
      %48 = arith.addf %46, %47 : vector<8x8x4xf32>
      %cst_22 = arith.constant dense<0xFF800000> : vector<8x4xf32>
      %49 = vector.multi_reduction <maximumf>, %48, %cst_22 [0] : vector<8x8x4xf32> to vector<8x4xf32>
      %50 = vector.shape_cast %49 : vector<8x4xf32> to vector<1x8x4xf32>
      %51 = vector.broadcast %50 : vector<1x8x4xf32> to vector<8x8x4xf32>
      %52 = arith.subf %48, %51 : vector<8x8x4xf32>
      %53 = math.exp %52 : vector<8x8x4xf32>
      %cst_23 = arith.constant dense<0.000000e+00> : vector<8x4xf32>
      %54 = vector.multi_reduction <add>, %53, %cst_23 [0] : vector<8x8x4xf32> to vector<8x4xf32>
      %55 = math.log %54 : vector<8x4xf32>
      %56 = arith.addf %55, %49 : vector<8x4xf32>
      %57 = vector.broadcast %36 : vector<1x4xf32> to vector<8x4xf32>
      %58 = arith.mulf %56, %57 : vector<8x4xf32>
      %cst_24 = arith.constant 1.000000e+00 : f32
      %59 = vector.broadcast %cst_24 : f32 to vector<1x4xf32>
      %60 = arith.subf %59, %36 : vector<1x4xf32>
      %61 = vector.broadcast %60 : vector<1x4xf32> to vector<8x4xf32>
      %62 = arith.mulf %41, %61 : vector<8x4xf32>
      %63 = arith.addf %58, %62 : vector<8x4xf32>
      %64 = vector.broadcast %2 : vector<8x1xf32> to vector<8x4xf32>
      %65 = arith.addf %64, %30 : vector<8x4xf32>
      %66 = vector.broadcast %24 : f32 to vector<8x4xf32>
      %67 = arith.mulf %66, %65 : vector<8x4xf32>
      %cst_25 = arith.constant 1.000000e+00 : f32
      %68 = arith.subf %cst_25, %24 : f32
      %69 = vector.broadcast %68 : f32 to vector<8x4xf32>
      %70 = arith.mulf %69, %63 : vector<8x4xf32>
      %71 = arith.addf %67, %70 : vector<8x4xf32>
      %c0_26 = arith.constant 0 : index
      %c0_27 = arith.constant 0 : index
      %72 = vector.load %arg11[%c0_26, %c0_27] : memref<8x4xf32, #tpu.memory_space<vmem>>, vector<8x4xf32>
      tpu.vector_store %arg11[%c0_26, %c0_27], %71 {strides = array<i32>} : memref<8x4xf32, #tpu.memory_space<vmem>>, vector<8x4xf32>,
      %c0_28 = arith.constant 0 : index
      %c0_29 = arith.constant 0 : index
      %73 = vector.load %arg13[%c0_28, %c0_29] : memref<8x4xf32, #tpu.memory_space<vmem>>, vector<8x4xf32>
      %74 = vector.shape_cast %73 : vector<8x4xf32> to vector<8x1x4xf32>
      %75 = vector.broadcast %74 : vector<8x1x4xf32> to vector<8x8x4xf32>
      %76 = vector.broadcast %0 : vector<8x8x1xf32> to vector<8x8x4xf32>
      %77 = arith.mulf %75, %76 : vector<8x8x4xf32>
      %cst_30 = arith.constant dense<0.000000e+00> : vector<8x4xf32>
      %78 = vector.multi_reduction <add>, %77, %cst_30 [0] : vector<8x8x4xf32> to vector<8x4xf32>
      %79 = arith.mulf %78, %40 : vector<8x4xf32>
      %cst_31 = arith.constant dense<0.000000e+00> : vector<4xf32>
      %80 = vector.multi_reduction <add>, %79, %cst_31 [0] : vector<8x4xf32> to vector<4xf32>
      %81 = vector.shape_cast %80 : vector<4xf32> to vector<1x4xf32>
      %82 = arith.mulf %30, %40 : vector<8x4xf32>
      %cst_32 = arith.constant dense<0.000000e+00> : vector<4xf32>
      %83 = vector.multi_reduction <add>, %82, %cst_32 [0] : vector<8x4xf32> to vector<4xf32>
      %84 = vector.shape_cast %83 : vector<4xf32> to vector<1x4xf32>
      %85 = vector.broadcast %2 : vector<8x1xf32> to vector<8x4xf32>
      %86 = arith.mulf %85, %40 : vector<8x4xf32>
      %cst_33 = arith.constant dense<0.000000e+00> : vector<4xf32>
      %87 = vector.multi_reduction <add>, %86, %cst_33 [0] : vector<8x4xf32> to vector<4xf32>
      %88 = vector.shape_cast %87 : vector<4xf32> to vector<1x4xf32>
      %c0_34 = arith.constant 0 : index
      %c0_35 = arith.constant 0 : index
      %89 = vector.load %arg12[%c0_34, %c0_35] : memref<1x4xf32, #tpu.memory_space<vmem>>, vector<1x4xf32>
      %90 = vector.broadcast %24 : f32 to vector<1x4xf32>
      %91 = arith.mulf %90, %88 : vector<1x4xf32>
      %92 = arith.addf %89, %91 : vector<1x4xf32>
      %cst_36 = arith.constant 1.000000e+00 : f32
      %93 = arith.subf %cst_36, %24 : f32
      %94 = vector.broadcast %93 : f32 to vector<1x4xf32>
      %95 = arith.mulf %94, %81 : vector<1x4xf32>
      %96 = arith.mulf %95, %36 : vector<1x4xf32>
      %97 = arith.addf %92, %96 : vector<1x4xf32>
      %98 = vector.broadcast %27 : f32 to vector<1x4xf32>
      %99 = arith.mulf %98, %84 : vector<1x4xf32>
      %100 = arith.mulf %99, %36 : vector<1x4xf32>
      %101 = arith.addf %97, %100 : vector<1x4xf32>
      %c0_37 = arith.constant 0 : index
      %c0_38 = arith.constant 0 : index
      %102 = vector.load %arg12[%c0_37, %c0_38] : memref<1x4xf32, #tpu.memory_space<vmem>>, vector<1x4xf32>
      tpu.vector_store %arg12[%c0_37, %c0_38], %101 {strides = array<i32>} : memref<1x4xf32, #tpu.memory_space<vmem>>, vector<1x4xf32>,
      %c0_39 = arith.constant 0 : index
      %c0_40 = arith.constant 0 : index
      %103 = vector.load %arg13[%c0_39, %c0_40] : memref<8x4xf32, #tpu.memory_space<vmem>>, vector<8x4xf32>
      tpu.vector_store %arg13[%c0_39, %c0_40], %40 {strides = array<i32>} : memref<8x4xf32, #tpu.memory_space<vmem>>, vector<8x4xf32>,
      %104 = vector.broadcast %36 : vector<1x4xf32> to vector<8x4xf32>
      %105 = arith.mulf %104, %40 : vector<8x4xf32>
      %cst_41 = arith.constant 1.000000e+00 : f32
      %106 = vector.broadcast %cst_41 : f32 to vector<1x4xf32>
      %107 = arith.subf %106, %36 : vector<1x4xf32>
      %c0_42 = arith.constant 0 : index
      %c0_43 = arith.constant 0 : index
      %108 = vector.load %arg14[%c0_42, %c0_43] : memref<8x4xf32, #tpu.memory_space<vmem>>, vector<8x4xf32>
      %109 = vector.broadcast %107 : vector<1x4xf32> to vector<8x4xf32>
      %110 = arith.mulf %109, %108 : vector<8x4xf32>
      %111 = arith.addf %105, %110 : vector<8x4xf32>
      %c0_44 = arith.constant 0 : index
      %c0_45 = arith.constant 0 : index
      %112 = vector.load %arg14[%c0_44, %c0_45] : memref<8x4xf32, #tpu.memory_space<vmem>>, vector<8x4xf32>
      tpu.vector_store %arg14[%c0_44, %c0_45], %111 {strides = array<i32>} : memref<8x4xf32, #tpu.memory_space<vmem>>, vector<8x4xf32>,
      %c0_46 = arith.constant 0 : index
      %c0_47 = arith.constant 0 : index
      %113 = vector.load %arg15[%c0_46, %c0_47] : memref<8x4xf32, #tpu.memory_space<vmem>>, vector<8x4xf32>
      %114 = vector.shape_cast %113 : vector<8x4xf32> to vector<8x1x4xf32>
      %115 = vector.broadcast %114 : vector<8x1x4xf32> to vector<8x8x4xf32>
      %116 = vector.broadcast %0 : vector<8x8x1xf32> to vector<8x8x4xf32>
      %117 = arith.addf %115, %116 : vector<8x8x4xf32>
      %cst_48 = arith.constant dense<0xFF800000> : vector<8x4xf32>
      %118 = vector.multi_reduction <maximumf>, %117, %cst_48 [0] : vector<8x8x4xf32> to vector<8x4xf32>
      %119 = vector.shape_cast %118 : vector<8x4xf32> to vector<1x8x4xf32>
      %120 = vector.broadcast %119 : vector<1x8x4xf32> to vector<8x8x4xf32>
      %121 = arith.cmpf oeq, %117, %120 : vector<8x8x4xf32>
      %c7_i32_49 = arith.constant 7 : i32
      %122 = vector.broadcast %c7_i32_49 : i32 to vector<8x8x4xi32>
      %123 = arith.select %121, %5, %122 : vector<8x8x4xi1>, vector<8x8x4xi32>
      %cst_50 = arith.constant dense<2147483647> : vector<8x4xi32>
      %124 = vector.multi_reduction <minsi>, %123, %cst_50 [0] : vector<8x8x4xi32> to vector<8x4xi32>
      %125 = arith.index_cast %19 : i32 to index
      %c0_51 = arith.constant 0 : index
      %c0_52 = arith.constant 0 : index
      %126 = vector.load %arg8[%125, %c0_51, %c0_52] : memref<4x8x4xi32, #tpu.memory_space<vmem>>, vector<1x8x4xi32>
      %127 = vector.shape_cast %126 : vector<1x8x4xi32> to vector<8x4xi32>
      %128 = vector.shape_cast %124 : vector<8x4xi32> to vector<1x8x4xi32>
      tpu.vector_store %arg8[%125, %c0_51, %c0_52], %128 {strides = array<i32>} : memref<4x8x4xi32, #tpu.memory_space<vmem>>, vector<1x8x4xi32>,
      %129 = arith.addf %118, %30 : vector<8x4xf32>
      %c0_53 = arith.constant 0 : index
      %c0_54 = arith.constant 0 : index
      %130 = vector.load %arg15[%c0_53, %c0_54] : memref<8x4xf32, #tpu.memory_space<vmem>>, vector<8x4xf32>
      tpu.vector_store %arg15[%c0_53, %c0_54], %129 {strides = array<i32>} : memref<8x4xf32, #tpu.memory_space<vmem>>, vector<8x4xf32>,
      %131 = vector.broadcast %36 : vector<1x4xf32> to vector<8x4xf32>
      %132 = arith.mulf %131, %129 : vector<8x4xf32>
      %cst_55 = arith.constant 1.000000e+00 : f32
      %133 = vector.broadcast %cst_55 : f32 to vector<1x4xf32>
      %134 = arith.subf %133, %36 : vector<1x4xf32>
      %c0_56 = arith.constant 0 : index
      %c0_57 = arith.constant 0 : index
      %135 = vector.load %arg16[%c0_56, %c0_57] : memref<8x4xf32, #tpu.memory_space<vmem>>, vector<8x4xf32>
      %136 = vector.broadcast %134 : vector<1x4xf32> to vector<8x4xf32>
      %137 = arith.mulf %136, %135 : vector<8x4xf32>
      %138 = arith.addf %132, %137 : vector<8x4xf32>
      %c0_58 = arith.constant 0 : index
      %c0_59 = arith.constant 0 : index
      %139 = vector.load %arg16[%c0_58, %c0_59] : memref<8x4xf32, #tpu.memory_space<vmem>>, vector<8x4xf32>
      tpu.vector_store %arg16[%c0_58, %c0_59], %138 {strides = array<i32>} : memref<8x4xf32, #tpu.memory_space<vmem>>, vector<8x4xf32>,
    }
    %c4_i32_7 = arith.constant 4 : i32
    %c1_i32_8 = arith.constant 1 : i32
    %15 = arith.cmpi eq, %arg1, %c1_i32_8 : i32
    %16 = arith.extui %15 : i1 to i32
    %c0_i32_9 = arith.constant 0 : i32
    %17 = arith.cmpi ne, %16, %c0_i32_9 : i32
    scf.if %17 {
      %c0_10 = arith.constant 0 : index
      %c0_11 = arith.constant 0 : index
      %18 = vector.load %arg11[%c0_10, %c0_11] : memref<8x4xf32, #tpu.memory_space<vmem>>, vector<8x4xf32>
      %19 = vector.broadcast %3 : vector<8x1xf32> to vector<8x4xf32>
      %20 = arith.addf %18, %19 : vector<8x4xf32>
      %cst_12 = arith.constant dense<0xFF800000> : vector<4xf32>
      %21 = vector.multi_reduction <maximumf>, %20, %cst_12 [0] : vector<8x4xf32> to vector<4xf32>
      %22 = vector.shape_cast %21 : vector<4xf32> to vector<1x4xf32>
      %23 = vector.broadcast %22 : vector<1x4xf32> to vector<8x4xf32>
      %24 = arith.subf %20, %23 : vector<8x4xf32>
      %25 = math.exp %24 : vector<8x4xf32>
      %cst_13 = arith.constant dense<0.000000e+00> : vector<4xf32>
      %26 = vector.multi_reduction <add>, %25, %cst_13 [0] : vector<8x4xf32> to vector<4xf32>
      %27 = vector.shape_cast %26 : vector<4xf32> to vector<1x4xf32>
      %28 = math.log %27 : vector<1x4xf32>
      %29 = arith.addf %28, %22 : vector<1x4xf32>
      %c0_14 = arith.constant 0 : index
      %c0_15 = arith.constant 0 : index
      %30 = vector.load %arg14[%c0_14, %c0_15] : memref<8x4xf32, #tpu.memory_space<vmem>>, vector<8x4xf32>
      %c3 = arith.constant 3 : index
      %c0_16 = arith.constant 0 : index
      %c0_17 = arith.constant 0 : index
      %31 = vector.load %arg2[%c3, %c0_16, %c0_17] : memref<4x8x4xf32, #tpu.memory_space<vmem>>, vector<1x8x4xf32>
      %32 = vector.shape_cast %31 : vector<1x8x4xf32> to vector<8x4xf32>
      %c3_18 = arith.constant 3 : index
      %c0_19 = arith.constant 0 : index
      %c0_20 = arith.constant 0 : index
      %33 = vector.load %arg4[%c3_18, %c0_19, %c0_20] : memref<4x1x4xf32, #tpu.memory_space<vmem>>, vector<1x1x4xf32>
      %34 = vector.shape_cast %33 : vector<1x1x4xf32> to vector<1x4xf32>
      %35 = vector.broadcast %3 : vector<8x1xf32> to vector<8x4xf32>
      %36 = arith.mulf %35, %30 : vector<8x4xf32>
      %cst_21 = arith.constant dense<0.000000e+00> : vector<4xf32>
      %37 = vector.multi_reduction <add>, %36, %cst_21 [0] : vector<8x4xf32> to vector<4xf32>
      %38 = vector.shape_cast %37 : vector<4xf32> to vector<1x4xf32>
      %39 = arith.mulf %32, %30 : vector<8x4xf32>
      %cst_22 = arith.constant dense<0.000000e+00> : vector<4xf32>
      %40 = vector.multi_reduction <add>, %39, %cst_22 [0] : vector<8x4xf32> to vector<4xf32>
      %41 = vector.shape_cast %40 : vector<4xf32> to vector<1x4xf32>
      %c0_23 = arith.constant 0 : index
      %c0_24 = arith.constant 0 : index
      %42 = vector.load %arg12[%c0_23, %c0_24] : memref<1x4xf32, #tpu.memory_space<vmem>>, vector<1x4xf32>
      %43 = arith.addf %42, %38 : vector<1x4xf32>
      %44 = arith.mulf %41, %34 : vector<1x4xf32>
      %45 = arith.addf %43, %44 : vector<1x4xf32>
      %46 = arith.subf %29, %45 : vector<1x4xf32>
      %c0_25 = arith.constant 0 : index
      %c0_26 = arith.constant 0 : index
      %47 = vector.load %arg7[%c0_25, %c0_26] : memref<1x4xf32, #tpu.memory_space<vmem>>, vector<1x4xf32>
      tpu.vector_store %arg7[%c0_25, %c0_26], %46 {strides = array<i32>} : memref<1x4xf32, #tpu.memory_space<vmem>>, vector<1x4xf32>,
      %c0_27 = arith.constant 0 : index
      %c0_28 = arith.constant 0 : index
      %48 = vector.load %arg16[%c0_27, %c0_28] : memref<8x4xf32, #tpu.memory_space<vmem>>, vector<8x4xf32>
      %49 = vector.broadcast %3 : vector<8x1xf32> to vector<8x4xf32>
      %50 = arith.addf %48, %49 : vector<8x4xf32>
      %cst_29 = arith.constant dense<0xFF800000> : vector<4xf32>
      %51 = vector.multi_reduction <maximumf>, %50, %cst_29 [0] : vector<8x4xf32> to vector<4xf32>
      %52 = vector.shape_cast %51 : vector<4xf32> to vector<1x4xf32>
      %53 = vector.broadcast %52 : vector<1x4xf32> to vector<8x4xf32>
      %54 = arith.cmpf oeq, %50, %53 : vector<8x4xf32>
      %c7_i32 = arith.constant 7 : i32
      %55 = vector.broadcast %c7_i32 : i32 to vector<8x4xi32>
      %56 = arith.select %54, %4, %55 : vector<8x4xi1>, vector<8x4xi32>
      %cst_30 = arith.constant dense<2147483647> : vector<4xi32>
      %57 = vector.multi_reduction <minsi>, %56, %cst_30 [0] : vector<8x4xi32> to vector<4xi32>
      %58 = vector.shape_cast %57 : vector<4xi32> to vector<1x4xi32>
      %c0_31 = arith.constant 0 : index
      %c0_32 = arith.constant 0 : index
      %59 = vector.load %arg9[%c0_31, %c0_32] : memref<1x4xi32, #tpu.memory_space<vmem>>, vector<1x4xi32>
      tpu.vector_store %arg9[%c0_31, %c0_32], %58 {strides = array<i32>} : memref<1x4xi32, #tpu.memory_space<vmem>>, vector<1x4xi32>,
      %c0_33 = arith.constant 0 : index
      %c0_34 = arith.constant 0 : index
      %60 = vector.load %arg10[%c0_33, %c0_34] : memref<1x4xf32, #tpu.memory_space<vmem>>, vector<1x4xf32>
      tpu.vector_store %arg10[%c0_33, %c0_34], %52 {strides = array<i32>} : memref<1x4xf32, #tpu.memory_space<vmem>>, vector<1x4xf32>,
    } else {
    }
    return
  }
  func.func @transform_0(%arg0: i32, %arg1: i32) -> (i32, i32, i32) {
    %c0_i32 = arith.constant 0 : i32
    %c0_i32_0 = arith.constant 0 : i32
    return %arg1, %c0_i32, %arg0 : i32, i32, i32
  }
  func.func @transform_1(%arg0: i32, %arg1: i32) -> (i32, i32, i32) {
    %c0_i32 = arith.constant 0 : i32
    %c0_i32_0 = arith.constant 0 : i32
    return %arg1, %c0_i32, %arg0 : i32, i32, i32
  }
  func.func @transform_2(%arg0: i32, %arg1: i32) -> (i32, i32, i32) {
    %c0_i32 = arith.constant 0 : i32
    %c0_i32_0 = arith.constant 0 : i32
    return %arg1, %c0_i32, %arg0 : i32, i32, i32
  }
  func.func @transform_3(%arg0: i32, %arg1: i32) -> (i32, i32, i32) {
    %c0_i32 = arith.constant 0 : i32
    %c0_i32_0 = arith.constant 0 : i32
    %c0_i32_1 = arith.constant 0 : i32
    %c0_i32_2 = arith.constant 0 : i32
    return %c0_i32, %c0_i32_0, %c0_i32_1 : i32, i32, i32
  }
  func.func @transform_4(%arg0: i32, %arg1: i32) -> (i32, i32) {
    %c0_i32 = arith.constant 0 : i32
    %c0_i32_0 = arith.constant 0 : i32
    %c0_i32_1 = arith.constant 0 : i32
    return %c0_i32, %c0_i32_0 : i32, i32
  }
  func.func @transform_5(%arg0: i32, %arg1: i32) -> (i32, i32) {
    %c0_i32 = arith.constant 0 : i32
    %c0_i32_0 = arith.constant 0 : i32
    return %c0_i32, %arg0 : i32, i32
  }
  func.func @transform_6(%arg0: i32, %arg1: i32) -> (i32, i32, i32) {
    %c0_i32 = arith.constant 0 : i32
    %c0_i32_0 = arith.constant 0 : i32
    return %arg1, %c0_i32, %arg0 : i32, i32, i32
  }
  func.func @transform_7(%arg0: i32, %arg1: i32) -> (i32, i32) {
    %c0_i32 = arith.constant 0 : i32
    %c0_i32_0 = arith.constant 0 : i32
    return %c0_i32, %arg0 : i32, i32
  }
  func.func @transform_8(%arg0: i32, %arg1: i32) -> (i32, i32) {
    %c0_i32 = arith.constant 0 : i32
    %c0_i32_0 = arith.constant 0 : i32
    return %c0_i32, %arg0 : i32, i32
  }
}

</mosaic_0001>

<bundles_post_ra>
// kernel: tpu_custom_call.1
= control target key start
LH: loop header
LB: loop body
LE: loop exit
PB: predicated region body
PF: predicated region fallthrough
CT: control target
= control target key end

     0   :  { %14 = vsyncpa [#allocation9], 0  ;;  %s1848_s0 = inlined_call_operand.vmem [shape: f32[8,8,4], index: 0, kind: input, shape index: {}]   ;;  %s1849_s1 = inlined_call_operand.vmem [shape: s32[8,1,4], index: 1, kind: input, shape index: {}]   ;;  %s1850_s2 = inlined_call_operand.vmem [shape: f32[8,1,4], index: 2, kind: input, shape index: {}]   ;;  %s1851_s3 = inlined_call_operand.vmem [shape: f32[8,8,1], index: 3, kind: input, shape index: {}]   ;;  %s1852_s4 = inlined_call_operand.vmem [shape: f32[8,1], index: 4, kind: input, shape index: {}]   ;;  %s1853_s5 = inlined_call_operand.hbm [shape: f32[1,4], index: 5, kind: output, shape index: {0}]   ;;  %s1854_s6 = inlined_call_operand.vmem [shape: s32[8,8,4], index: 6, kind: output, shape index: {1}]   ;;  %s1855_s7 = inlined_call_operand.hbm [shape: s32[1,4], index: 7, kind: output, shape index: {2}]   ;;  %s1856_s8 = inlined_call_operand.hbm [shape: f32[1,4], index: 8, kind: output, shape index: {3}]  }
   0x1   :  { %15 = vsyncpa [#allocation11], 0  ;;  %s1367_s27 = smov 0   ;;  %s1369_s28 = smov 0  }
   0x2   :  { %s1371_s29 = smov 0  }
   0x3 LB: > { %s1074_s30 = sadd.s32 4294967295, %s1306_s29   ;;  %s30_s9 = sadd.s32 1, %s1302_s28  ;;  %s1306_s29 = sphi %s1371_s29, %s21_s29   ;;  %s1302_s28 = sphi %s1369_s28, %s1859_s28   ;;  %s1298_s27 = sphi %s1367_s27, %s1858_s27  }
   0x4   : > { %p31_p0 = scmp.ge.s32.totalorder %s30_s9, 2  ;;  %p1078_p1 = scmp.ge.s32.totalorder %s1306_s29, 1 }
   0x5   : > { %p321_p2 = scmp.lt.s32.totalorder %s1306_s29, 3 }
   0x6   : > { %s1861_s9 = smov (%p31_p0, %s30_s9), 0 }
   0x7   : > { %p322_p3 = pnand %p1078_p1, %p321_p2 }
   0x8   : > { %s1389_s10 = sshll.u32 (!%p322_p3), %s1298_s27, 2  ;;  %p1085_p5 = scmp.ne.s32.totalorder (!%p322_p3), %s1298_s27, 0 }
   0x9   : > { %325 = sbr.rel (%p322_p3) target bundleno = 405 (0x195), region = 40  ;;  %p376_p4 = scmp.lt.s32.totalorder (!%p322_p3), %s1389_s10, 7 }
   0xe   : > { %v1394_v0 = vld [vmem:[%s1851_s3] sm:$0xff]  ;;  %v1399_v1 = vld [vmem:[%s1851_s3 + $0x8] sm:$0xff]  ;;  %v1404_v2 = vld [vmem:[%s1851_s3 + $0x10] sm:$0xff]  ;;  %v418_v3 = vlaneseq  ;;  %s1440_s13 = scalar_select %p376_p4, %s1389_s10, 7  ;;  %v1312_v11 = vmov -10000.0  }
   0xf   : > { %v1410_v4 = vld [vmem:[%s1851_s3 + $0x18] sm:$0xff]  ;;  %v1415_v5 = vld [vmem:[%s1851_s3 + $0x20] sm:$0xff]  ;;  %v1420_v6 = vld [vmem:[%s1851_s3 + $0x28] sm:$0xff]  ;;  %425 = sbr.rel (%p1085_p5) target bundleno = 27 (0x1b), region = 44 }
  0x10   : > { %v1425_v7 = vld [vmem:[%s1851_s3 + $0x30] sm:$0xff]  ;;  %v1430_v8 = vld [vmem:[%s1851_s3 + $0x38] sm:$0xff]  ;;  %v1435_v9 = vld [vmem:[%s1852_s4] sm:$0xff]  ;;  %v1437_v10 = vshrl.u32 %v418_v3, 7  ;;  %s1080_s14 = sshll.u32 %s1440_s13, 3  ;;  %s390_s17 = scalar_lea.vmem %s1849_s1, %s1440_s13 }
  0x11   : > { %s1451_s20 = scalar_lea.vmem %s1848_s0, %s1080_s14  ;;  %s1457_s23 = scalar_lea.vmem %s1850_s2, %s1440_s13 }
  0x12   : > { %vm420_vm0 = vcmp.eq.s32.totalorder %v1437_v10, 6  ;;  %s1462_s26 = scalar_lea.vmem %s1854_s6, %s1080_s14 }
  0x13   : > { %v421_v12 = vsel %vm420_vm0, 0.0, %v1312_v11 }
  0x14   : > { %vm426_vm1 = vcmask 31744   ;;  %v1313_v13 = vmov 0.0   ;;  %vm428_vm2 = vcmask 24576  }
  0x15   : > { %427 = vst.msk [vmem:[#allocation2] sm:$0xff] %vm426_vm1, %v1313_v13 }
  0x16   : > { %430 = vst.msk [vmem:[#allocation4] sm:$0xff] %vm426_vm1, %v1313_v13 }
  0x17   : > { %431 = vst.msk [vmem:[#allocation5] sm:$0xff] %vm426_vm1, %v1313_v13 }
  0x18   : > { %432 = vst.msk [vmem:[#allocation6] sm:$0xff] %vm426_vm1, %v421_v12 }
  0x19   : > { %433 = vst.msk [vmem:[#allocation7] sm:$0xff] %vm426_vm1, %v421_v12 }
  0x1a   : > { %429 = vst.msk [vmem:[#allocation3] sm:$0x1] %vm428_vm2, %v1313_v13 }
  0x1b PF: > { %s1465_s11 = smov 0  }
  0x1c LB: >> { %v1314_v14 = vmov 0   ;;  %s451_s15 = scalar_lea.vmem %s390_s17, %s1310_s11  ;;  %v1484_v16 = vld [vmem:[#allocation2] sm:$0xff]  ;;  %vm540_vm4 = vcmask 31744   ;;  %s1087_s16 = sshll.u32 %s1310_s11, 3  ;;  %v1315_v18 = vmov 0.0   ;;  %vm698_vm12 = vcmask 24576   ;;  %s1310_s11 = sphi %s1465_s11, %s439_s11  }
  0x1d   : >> { %1161 = vset.pattern.permute.xlu1 %v1314_v14  ;;  %1160 = vset.pattern.permute.xlu0 %v1314_v14  ;;  %v1163_v15 = vld [vmem:[%s451_s15] ss:$0 sm:$0xff]  ;;  %v1487_v17 = vld [vmem:[#allocation4] sm:$0xff]  ;;  %v464_v20 = vrot.slane %v1484_v16, 4  ;;  %s449_s18 = scalar_lea.vmem %s1451_s20, %s1087_s16  ;;  %v462_v23 = vrot.slane %v1484_v16, 2  ;;  %v465_v29 = vrot.slane %v1484_v16, 5  ;;  %s1529_s19 = sadd.s32 %s1310_s11, %s1389_s10 }
  0x1e   : >> { %504 = vperm.xlu1 %1161, %v1404_v2   ;;  %494 = vperm.xlu0 %1160, %v1394_v0   ;;  %vm456_vm3 = vcmp.eq.s32.totalorder %v1437_v10, %v1163_v15  ;;  %v621_v22 = vrot.slane %v1487_v17, 4  ;;  %v1503_v27 = vld [vmem:[%s449_s18] sm:$0xff]  ;;  %v619_v28 = vrot.slane %v1487_v17, 2  ;;  %v463_v31 = vrot.slane %v1484_v16, 3  ;;  %p442_p6 = scmp.eq.s32.totalorder %s1529_s19, 0  ;;  %s1560_s21 = scalar_lea.vmem %s1457_s23, %s1310_s11 }
  0x1f   : >> { %1162 = vset.pattern.permute.xlu2 %v1314_v14  ;;  %v1490_v19 = vsel %vm456_vm3, 1.0, %v1315_v18  ;;  %v1495_v21 = vld [vmem:[#allocation6] sm:$0xff]  ;;  %v472_v26 = vperm.slane %v464_v20, 0  ;;  %v470_v33 = vperm.slane %v462_v23, 0  ;;  %v468_v36 = vperm.slane %v1484_v16, 0  ;;  %p445_p7 = scmp.lt.s32.totalorder %s1529_s19, 7  ;;  %s790_s15 = scalar_lea.vmem %s1462_s26, %s1087_s16 }
  0x20   : >> { %514 = vperm.xlu2 %1162, %v1415_v5   ;;  %700 = vst.msk [vmem:[#allocation4] sm:$0xff] %vm540_vm4, %v1490_v19  ;;  %v711_v24 = vrot.slane %v1495_v21, 4  ;;  %v709_v30 = vrot.slane %v1495_v21, 2  ;;  %v629_v32 = vperm.slane %v621_v22, 0  ;;  %v622_v37 = vrot.slane %v1487_v17, 5  ;;  %s439_s11 = sadd.s32 1, %s1310_s11  }
  0x21   : >> { %v488_v35 = vadd.f32 %v472_v26, %v1503_v27  ;;  %v1512_v38 = vperm.slane %v619_v28, 0  ;;  %v712_v39 = vrot.slane %v1495_v21, 5  ;;  %v473_v40 = vperm.slane %v465_v29, 0  ;;  %s1571_s22 = scalar_select %p442_p6, 1, 0 }
  0x22   : >> { %v719_v34 = vperm.slane %v711_v24, 0  ;;  %v620_v41 = vrot.slane %v1487_v17, 3  ;;  %v1516_v42 = vperm.slane %v709_v30, 0  ;;  %v710_v43 = vrot.slane %v1495_v21, 3  ;;  %s1626_s25 = scalar_select %p445_p7, 1, 0 }
  0x23   : >> { %v471_v44 = vperm.slane %v463_v31, 0  ;;  %v461_v45 = vrot.slane %v1484_v16, 1  ;;  %v486_v46 = vadd.f32 %v470_v33, %v1503_v27  ;;  %v625_v47 = vperm.slane %v1487_v17, 0  ;;  %s444_s24 = scvt.s32.f32 %s1571_s22  ;;  %p436_p8 = scmp.ge.s32.totalorder %s439_s11, 4  }
  0x24   : >> { %v715_v48 = vperm.slane %v1495_v21, 0  ;;  %v618_v49 = vrot.slane %v1487_v17, 1  ;;  %v484_v50 = vadd.f32 %v468_v36, %v1503_v27  ;;  %v630_v51 = vperm.slane %v622_v37, 0  ;;  %s447_s12 = scvt.s32.f32 %s1626_s25  ;;  %p1089_p9 = scmp.ne.s32.totalorder (%p436_p8), %s1298_s27, 1 }
  0x25   : >> { %v708_v52 = vrot.slane %v1495_v21, 1  ;;  %v467_v53 = vrot.slane %v1484_v16, 7  ;;  %v720_v56 = vperm.slane %v712_v39, 0  ;;  %v489_v57 = vadd.f32 %v473_v40, %v1503_v27  ;;  %s1679_s14 = ssub.f32 1.0, %s444_s24 }
  0x26   : >> { %509 = vperm.xlu1 %1161, %v1410_v4   ;;  %499 = vperm.xlu0 %1160, %v1399_v1   ;;  %v628_v58 = vperm.slane %v620_v41, 0  ;;  %v466_v59 = vrot.slane %v1484_v16, 6  ;;  %v1537_v62 = vperm.slane %v710_v43, 0  ;;  %v487_v63 = vadd.f32 %v471_v44, %v1503_v27 }
  0x27   : >> { %v469_v3 = vperm.slane %v461_v45, 0  ;;  %v626_v13 = vperm.slane %v618_v49, 0  ;;  %v624_v14 = vrot.slane %v1487_v17, 7  ;;  %v716_v15 = vperm.slane %v708_v52, 0  ;;  %v1580_v45 = vld [vmem:[%s1560_s21] sm:$0x1] }
  0x28   : >> { %519 = vperm.xlu2 %1162, %v1420_v6   ;;  %v714_v18 = vrot.slane %v1495_v21, 7  ;;  %v475_v20 = vperm.slane %v467_v53, 0  ;;  %v623_v22 = vrot.slane %v1487_v17, 6  ;;  %v713_v24 = vrot.slane %v1495_v21, 6 }
  0x29   : >> { %v474_v26 = vperm.slane %v466_v59, 0  ;;  %v485_v31 = vadd.f32 %v469_v3, %v1503_v27  ;;  %v602_v3 = vsub.f32 1.0, %v1580_v45 }
  0x2a   : >> { %v631_v36 = vperm.slane %v623_v22, 0  ;;  %v1577_v44 = vperm.slane %v713_v24, 0 }
  0x2b   : >> { %v490_v49 = vadd.f32 %v474_v26, %v1503_v27 }
  0x2e   : >> { %529 = vperm.xlu1 %1161, %v1430_v8   ;;  %524 = vperm.xlu0 %1160, %v1425_v7  }
  0x7a   : >> { %v515_v25 = vpop.permute.xlu2 %514 }
  0x7b   : >> { %v1535_v60 = vadd.f32 %v515_v25, %v488_v35  ;;  %v645_v11 = vmul.f32 %v629_v32, %v515_v25  ;;  %v1540_v12 = vadd.f32 %v719_v34, %v515_v25  ;;  %v672_v25 = vmul.f32 %v1490_v19, %v1503_v27 }
  0x7c   : >> { %v1567_v32 = vperm.slane %v624_v14, 0  ;;  %v722_v34 = vperm.slane %v714_v18, 0  ;;  %v491_v35 = vadd.f32 %v475_v20, %v1503_v27 }
  0x7d   : >> { %v1553_v28 = vsel %vm540_vm4, %v1535_v60, -inf  ;;  %v656_v17 = vsel %vm540_vm4, %v645_v11, 0.0  ;;  %v1565_v21 = vsel %vm540_vm4, %v1540_v12, -inf  ;;  %v673_v33 = vsel %vm540_vm4, %v672_v25, 0.0 }
  0x7e   : >> { %v674_v37 = vrot.slane %v673_v33, 4 }
  0x80   : >> { %v675_v59 = vadd.f32 %v674_v37, %v673_v33 }
  0x82   : >> { %v520_v61 = vpop.permute.xlu2 %519  ;;  %v676_v18 = vrot.slane %v675_v59, 2 }
  0x83   : >> { %v1546_v23 = vadd.f32 %v520_v61, %v489_v57  ;;  %v646_v29 = vmul.f32 %v630_v51, %v520_v61  ;;  %v1555_v30 = vadd.f32 %v720_v56, %v520_v61 }
  0x84   : >> { %v677_v26 = vadd.f32 %v676_v18, %v675_v59 }
  0x85   : >> { %v547_v40 = vsel %vm540_vm4, %v1546_v23, -inf  ;;  %v658_v52 = vsel %vm540_vm4, %v646_v29, 0.0  ;;  %v1588_v53 = vsel %vm540_vm4, %v1555_v30, -inf }
  0x90   : >> { %v1531_v54 = vpop.permute.xlu1 %504  ;;  %v495_v55 = vpop.permute.xlu0 %494 }
  0x91   : >> { %v641_v39 = vmul.f32 %v625_v47, %v495_v55  ;;  %v1583_v51 = vadd.f32 %v495_v55, %v484_v50  ;;  %v643_v47 = vmul.f32 %v1512_v38, %v1531_v54  ;;  %v1596_v61 = vadd.f32 %v1531_v54, %v486_v46 }
  0x92   : >> { %v1598_v50 = vadd.f32 %v715_v48, %v495_v55  ;;  %v1316_v46 = vmov 2147483647   ;;  %v1620_v25 = vadd.f32 %v1516_v42, %v1531_v54 }
  0x93   : >> { %v649_v11 = vsel %vm540_vm4, %v641_v39, 0.0  ;;  %v1609_v48 = vsel %vm540_vm4, 7, %v1316_v46  ;;  %v652_v55 = vsel %vm540_vm4, %v643_v47, 0.0  ;;  %v543_v33 = vsel %vm540_vm4, %v1596_v61, -inf }
  0x94   : >> { %v739_v39 = vsel %vm540_vm4, %v1598_v50, -inf }
  0x98   : >> { %v510_v41 = vpop.permute.xlu1 %509  ;;  %v500_v43 = vpop.permute.xlu0 %499 }
  0x99   : >> { %v1592_v56 = vadd.f32 %v500_v43, %v485_v31  ;;  %v642_v57 = vmul.f32 %v626_v13, %v500_v43  ;;  %v644_v14 = vmul.f32 %v628_v58, %v510_v41  ;;  %v541_v13 = vsel %vm540_vm4, %v1583_v51, -inf }
  0x9a   : >> { %v1606_v22 = vadd.f32 %v716_v15, %v500_v43  ;;  %v1616_v58 = vstv %s444_s24  ;;  %v1622_v29 = vadd.f32 %v510_v41, %v487_v63  ;;  %v1628_v31 = vperm.slane %v602_v3, 0 }
  0x9b   : >> { %v650_v38 = vsel %vm540_vm4, %v642_v57, 0.0  ;;  %v542_v24 = vsel %vm540_vm4, %v1592_v56, -inf  ;;  %v546_v37 = vmax.f32 %v541_v13, %v1553_v28  ;;  %v654_v42 = vsel %vm540_vm4, %v644_v14, 0.0 }
  0x9c   : >> { %v651_v20 = vadd.f32 %v650_v38, %v649_v11  ;;  %v548_v43 = vmax.f32 %v542_v24, %v547_v40  ;;  %v740_v57 = vsel %vm540_vm4, %v1606_v22, -inf  ;;  %v678_v38 = vrot.slane %v677_v26, 1 }
  0x9d   : >> { %v544_v14 = vsel %vm540_vm4, %v1622_v29, -inf  ;;  %v1649_v18 = vadd.f32 %v1537_v62, %v510_v41 }
  0x9e   : >> { %v653_v15 = vadd.f32 %v652_v55, %v651_v20  ;;  %v553_v20 = vmax.f32 %v546_v37, %v548_v43  ;;  %v679_v24 = vadd.f32 %v678_v38, %v677_v26  ;;  %v694_v37 = vstv %s447_s12 }
  0x9f   : >> { %v741_v26 = vsel %vm540_vm4, %v1620_v25, -inf }
  0xa0   : >> { %v530_v54 = vpop.permute.xlu1 %529  ;;  %v1636_v63 = vpop.permute.xlu0 %524  ;;  %v655_v47 = vadd.f32 %v654_v42, %v653_v15 }
  0xa1   : >> { %v1640_v59 = vadd.f32 %v530_v54, %v491_v35  ;;  %v738_v3 = vadd.f32 %v722_v34, %v530_v54  ;;  %v1643_v11 = vadd.f32 %v1636_v63, %v490_v49  ;;  %v647_v28 = vmul.f32 %v631_v36, %v1636_v63 }
  0xa2   : >> { %v657_v40 = vadd.f32 %v656_v17, %v655_v47  ;;  %v746_v35 = vmax.f32 %v740_v57, %v1588_v53  ;;  %v648_v49 = vmul.f32 %v1567_v32, %v530_v54  ;;  %v680_v62 = vmul.f32 %v1490_v19, %v1636_v63 }
  0xa3   : >> { %v551_v13 = vsel %vm540_vm4, %v1640_v59, -inf  ;;  %v549_v36 = vsel %vm540_vm4, %v1643_v11, -inf  ;;  %v749_v17 = vsel %vm540_vm4, %v738_v3, -inf  ;;  %v660_v41 = vsel %vm540_vm4, %v647_v28, 0.0 }
  0xa4   : >> { %v552_v34 = vmax.f32 %v544_v14, %v551_v13  ;;  %v659_v46 = vadd.f32 %v658_v52, %v657_v40  ;;  %v550_v55 = vmax.f32 %v543_v33, %v549_v36  ;;  %v1664_v53 = vadd.f32 %v1577_v44, %v1636_v63 }
  0xa5   : >> { %v681_v42 = vsel %vm540_vm4, %v680_v62, 0.0  ;;  %v744_v52 = vmax.f32 %v739_v39, %v1565_v21  ;;  %v662_v33 = vsel %vm540_vm4, %v648_v49, 0.0  ;;  %v742_v44 = vsel %vm540_vm4, %v1649_v18, -inf }
  0xa6   : >> { %v554_v32 = vmax.f32 %v550_v55, %v552_v34  ;;  %v661_v15 = vadd.f32 %v660_v41, %v659_v46  ;;  %v682_v54 = vrot.slane %v681_v42, 4  ;;  %v747_v43 = vsel %vm540_vm4, %v1664_v53, -inf  ;;  %v795_v55 = vld [vmem:[#allocation7] sm:$0xff] }
  0xa7   : >> { %v751_v3 = vmax.f32 %v744_v52, %v746_v35  ;;  %v750_v28 = vmax.f32 %v742_v44, %v749_v17  ;;  %v695_v21 = vmul.f32 %v694_v37, %v679_v24  ;;  %v748_v39 = vmax.f32 %v741_v26, %v747_v43 }
  0xa8   : >> { %v1675_v47 = vmax.f32 %v553_v20, %v554_v32  ;;  %v663_v57 = vadd.f32 %v662_v33, %v661_v15  ;;  %v683_v36 = vadd.f32 %v682_v54, %v681_v42  ;;  %v612_v62 = vstv %s1679_s14 }
  0xa9   : >> { %v752_v17 = vmax.f32 %v748_v39, %v750_v28  ;;  %v1703_v42 = vmul.f32 %v695_v21, %v1580_v45  ;;  %v1317_v39 = vmov 7  }
  0xaa   : >> { %v556_v38 = vsub.f32 %v1583_v51, %v1675_v47  ;;  %v557_v14 = vsub.f32 %v1592_v56, %v1675_v47  ;;  %v558_v40 = vsub.f32 %v1596_v61, %v1675_v47  ;;  %v559_v13 = vsub.f32 %v1622_v29, %v1675_v47 }
  0xab   : >> { %v560_v35 = vsub.f32 %v1535_v60, %v1675_v47  ;;  %v561_v34 = vsub.f32 %v1546_v23, %v1675_v47  ;;  %v562_v49 = vsub.f32 %v1643_v11, %v1675_v47  ;;  %v664_v56 = vmul.f32 %v1490_v19, %v663_v57  ;;  %v702_v57 = vld [vmem:[#allocation5] sm:$0xff] }
  0xac   : >> { %v564_v51 = vmul.f32 1.442695, %v556_v38  ;;  %v566_v20 = vmul.f32 1.442695, %v557_v14  ;;  %v568_v46 = vmul.f32 1.442695, %v558_v40  ;;  %v563_v61 = vsub.f32 %v1640_v59, %v1675_v47 }
  0xad   : >> { %v570_v29 = vmul.f32 1.442695, %v559_v13  ;;  %v572_v60 = vmul.f32 1.442695, %v560_v35  ;;  %v574_v41 = vmul.f32 1.442695, %v561_v34  ;;  %v1700_v32 = vmax.f32 %v751_v3, %v752_v17 }
  0xae   : >> { %1165 = vpow2.f32 %v564_v51  ;;  %v665_v23 = vsel %vm540_vm4, %v664_v56, 0.0  ;;  %v684_v24 = vrot.slane %v683_v36, 2  ;;  %v576_v15 = vmul.f32 1.442695, %v562_v49  ;;  %v1728_v13 = vld [vmem:[%s1560_s21] ss:$0 sm:$0xff] }
  0xaf   : >> { %1167 = vpow2.f32 %v566_v20  ;;  %v666_v11 = vrot.slane %v665_v23, 4  ;;  %v1706_v59 = vmul.f32 %v795_v55, %v1628_v31  ;;  %v578_v37 = vmul.f32 1.442695, %v563_v61 }
  0xb0   : >> { %1169 = vpow2.f32 %v568_v46  ;;  %v685_v33 = vadd.f32 %v684_v24, %v683_v36  ;;  %vm754_vm5 = vcmp.eq.f32.partialorder %v1598_v50, %v1700_v32  ;;  %vm755_vm6 = vcmp.eq.f32.partialorder %v1606_v22, %v1700_v32  ;;  %v688_v36 = vld [vmem:[#allocation3] sm:$0x1] }
  0xb1   : >> { %1171 = vpow2.f32 %v570_v29  ;;  %v667_v52 = vadd.f32 %v666_v11, %v665_v23  ;;  %vm756_vm7 = vcmp.eq.f32.partialorder %v1620_v25, %v1700_v32  ;;  %vm757_vm8 = vcmp.eq.f32.partialorder %v1649_v18, %v1700_v32 }
  0xb2   : >> { %1173 = vpow2.f32 %v572_v60  ;;  %v686_v43 = vrot.slane %v685_v33, 1  ;;  %vm758_vm9 = vcmp.eq.f32.partialorder %v1540_v12, %v1700_v32  ;;  %vm759_vm10 = vcmp.eq.f32.partialorder %v1555_v30, %v1700_v32 }
  0xb3   : >> { %1175 = vpow2.f32 %v574_v41  ;;  %v668_v54 = vrot.slane %v667_v52, 2  ;;  %vm760_vm11 = vcmp.eq.f32.partialorder %v1664_v53, %v1700_v32  ;;  %v761_v38 = vsel %vm754_vm5, 0, %v1317_v39 }
  0xb4   : >> { %v1166_v26 = vpop.eup %1165  ;;  %1177 = vpow2.f32 %v576_v15  ;;  %v687_v21 = vadd.f32 %v686_v43, %v685_v33  ;;  %v762_v35 = vsel %vm755_vm6, 1, %v1317_v39  ;;  %v763_v34 = vsel %vm756_vm7, 2, %v1317_v39 }
  0xb5   : >> { %v1168_v44 = vpop.eup %1167  ;;  %v580_v3 = vsel %vm540_vm4, %v1166_v26, 0.0  ;;  %v669_v28 = vadd.f32 %v668_v54, %v667_v52  ;;  %1179 = vpow2.f32 %v578_v37  ;;  %v764_v46 = vsel %vm757_vm8, 3, %v1317_v39 }
  0xb6   : >> { %v1170_v14 = vpop.eup %1169  ;;  %v581_v40 = vsel %vm540_vm4, %v1168_v44, 0.0  ;;  %v689_v50 = vmul.f32 %v687_v21, %v1616_v58  ;;  %v701_v25 = vmul.f32 %v1728_v13, %v1490_v19  ;;  %v703_v61 = vmul.f32 %v702_v57, %v1628_v31 }
  0xb7   : >> { %v1172_v49 = vpop.eup %1171  ;;  %v582_v51 = vadd.f32 %v581_v40, %v580_v3  ;;  %v670_v20 = vrot.slane %v669_v28, 1  ;;  %v583_v22 = vsel %vm540_vm4, %v1170_v14, 0.0  ;;  %v765_v18 = vsel %vm758_vm9, 4, %v1317_v39 }
  0xb8   : >> { %v1174_v56 = vpop.eup %1173  ;;  %v585_v55 = vsel %vm540_vm4, %v1172_v49, 0.0  ;;  %v690_v24 = vadd.f32 %v689_v50, %v688_v36  ;;  %v704_v15 = vadd.f32 %v703_v61, %v701_v25  ;;  %v766_v19 = vsel %vm759_vm10, 5, %v1317_v39 }
  0xb9   : >> { %v1176_v29 = vpop.eup %1175  ;;  %v584_v17 = vadd.f32 %v583_v22, %v582_v51  ;;  %v587_v60 = vsel %vm540_vm4, %v1174_v56, 0.0  ;;  %v671_v41 = vadd.f32 %v670_v20, %v669_v28  ;;  %v767_v33 = vsel %vm760_vm11, 6, %v1317_v39 }
  0xba   : >> { %v1178_v23 = vpop.eup %1177  ;;  %v589_v11 = vsel %vm540_vm4, %v1176_v29, 0.0  ;;  %v768_v54 = vsel %vm540_vm4, %v761_v38, 2147483647  ;;  %705 = vst.msk [vmem:[#allocation5] sm:$0xff] %vm540_vm4, %v704_v15  ;;  %v769_v26 = vsel %vm540_vm4, %v762_v35, 2147483647  ;;  %v792_v30 = vadd.f32 %v1700_v32, %v1503_v27 }
  0xbb   : >> { %v586_v37 = vadd.f32 %v585_v55, %v584_v17  ;;  %v691_v52 = vmul.f32 %v671_v41, %v612_v62  ;;  %v1180_v12 = vpop.eup %1179  ;;  %v591_v43 = vsel %vm540_vm4, %v1178_v23, 0.0  ;;  %v770_v44 = vsel %vm540_vm4, %v763_v34, 2147483647 }
  0xbc   : >> { %v771_v53 = vsel %vm540_vm4, %v764_v46, 2147483647  ;;  %v772_v28 = vsel %vm540_vm4, %v765_v18, 2147483647  ;;  %v775_v21 = vsel %vm540_vm4, %v766_v19, 2147483647  ;;  %v794_v35 = vmul.f32 %v1728_v13, %v792_v30 }
  0xbd   : >> { %v588_v57 = vadd.f32 %v587_v60, %v586_v37  ;;  %v692_v3 = vmul.f32 %v691_v52, %v1580_v45  ;;  %vm773_vm13 = vcmp.lt.s32.totalorder %v768_v54, %v772_v28  ;;  %v778_v39 = vsel %vm540_vm4, %v767_v33, 2147483647  ;;  %793 = vst.msk [vmem:[#allocation6] sm:$0xff] %vm540_vm4, %v792_v30 }
  0xbe   : >> { %vm782_vm14 = vcmp.lt.s32.totalorder %v771_v53, %v1609_v48  ;;  %v774_v40 = vsel %vm773_vm13, %v768_v54, %v772_v28  ;;  %vm776_vm15 = vcmp.lt.s32.totalorder %v769_v26, %v775_v21  ;;  %vm779_vm0 = vcmp.lt.s32.totalorder %v770_v44, %v778_v39 }
  0xbf   : >> { %v590_v38 = vadd.f32 %v589_v11, %v588_v57  ;;  %v693_v14 = vadd.f32 %v692_v3, %v690_v24  ;;  %v777_v45 = vsel %vm776_vm15, %v769_v26, %v775_v21  ;;  %v783_v32 = vsel %vm782_vm14, %v771_v53, %v1609_v48 }
  0xc0   : >> { %v780_v36 = vsel %vm779_vm0, %v770_v44, %v778_v39  ;;  %vm784_vm1 = vcmp.lt.s32.totalorder %v774_v40, %v777_v45  ;;  %v593_v51 = vsel %vm540_vm4, %v1180_v12, 0.0  ;;  %v797_v50 = vadd.f32 %v1706_v59, %v794_v35 }
  0xc1   : >> { %v592_v34 = vadd.f32 %v591_v43, %v590_v38  ;;  %v697_v49 = vadd.f32 %v1703_v42, %v693_v14  ;;  %v785_v20 = vsel %vm784_vm1, %v774_v40, %v777_v45  ;;  %vm786_vm2 = vcmp.lt.s32.totalorder %v780_v36, %v783_v32 }
  0xc2   : >> { %v787_v56 = vsel %vm786_vm2, %v780_v36, %v783_v32  ;;  %798 = vst.msk [vmem:[#allocation7] sm:$0xff] %vm540_vm4, %v797_v50  ;;  %v606_v59 = vmul.f32 %v1628_v31, %v1484_v16  ;;  %v608_v61 = vadd.f32 %v1636_v63, %v1503_v27 }
  0xc3   : >> { %v594_v46 = vadd.f32 %v593_v51, %v592_v34  ;;  %699 = vst.msk [vmem:[#allocation3] sm:$0x1] %vm698_vm12, %v697_v49  ;;  %vm788_vm3 = vcmp.lt.s32.totalorder %v785_v20, %v787_v56 }
  0xc4   : >> { %v789_v48 = vsel %vm788_vm3, %v785_v20, %v787_v56  ;;  %v610_v17 = vmul.f32 %v1616_v58, %v608_v61 }
  0xc5   : >> { %1181 = vlog2.f32 %v594_v46  ;;  %791 = vst.msk [vmem:[%s790_s15] sm:$0xff] %vm540_vm4, %v789_v48 }
  0xcb   : >> { %v1182_v42 = vpop.eup %1181 }
  0xcc   : >> { %v596_v22 = vmul.f32 0.6931472, %v1182_v42 }
  0xce   : >> { %v597_v55 = vadd.f32 %v596_v22, %v1675_v47 }
  0xd0   : >> { %v601_v25 = vmul.f32 %v1728_v13, %v597_v55 }
  0xd2   : >> { %v607_v29 = vadd.f32 %v606_v59, %v601_v25 }
  0xd4   : >> { %v613_v60 = vmul.f32 %v612_v62, %v607_v29  ;;  %438 = sbr.rel (!%p436_p8) target bundleno = 28 (0x1c), region = 125 }
  0xd6   : >> { %v614_v41 = vadd.f32 %v613_v60, %v610_v17 }
  0xd8   : >> { %615 = vst.msk [vmem:[#allocation2] sm:$0xff] %vm540_vm4, %v614_v41 }
  0xd9   : > { %802 = sbr.rel (%p1089_p9) target bundleno = 392 (0x188), region = 55 }
  0xde   : > { %v1318_v16 = vmov 0   ;;  %v859_v27 = vld [vmem:[#allocation7] sm:$0xff]  ;;  %v831_v6 = vld [vmem:[#allocation5] sm:$0xff] }
  0xdf   : > { %1183 = vset.pattern.permute.xlu0 %v1318_v16  ;;  %v803_v58 = vld [vmem:[#allocation2] sm:$0xff]  ;;  %v1090_v7 = vld [vmem:[%s1451_s20 + $0x18] sm:$0xff]  ;;  %v852_v59 = vld [vmem:[#allocation3] sm:$0x1] }
  0xe0   : > { %806 = vperm.xlu0 %1183, %v1435_v9   ;;  %v844_v24 = vmul.f32 %v1090_v7, %v831_v6  ;;  %v1091_v55 = vld [vmem:[%s1457_s23 + $0x3] sm:$0x1] }
  0xe2   : > { %v845_v54 = vsel %vm540_vm4, %v844_v24, 0.0 }
  0xe3   : > { %v846_v30 = vrot.slane %v845_v54, 4 }
  0xe5   : > { %v847_v28 = vadd.f32 %v846_v30, %v845_v54 }
  0xe7   : > { %v848_v45 = vrot.slane %v847_v28, 2 }
  0xe9   : > { %v849_v36 = vadd.f32 %v848_v45, %v847_v28 }
  0xeb   : > { %v850_v46 = vrot.slane %v849_v36, 1 }
  0xed   : > { %v851_v42 = vadd.f32 %v850_v46, %v849_v36 }
  0xef   : > { %v854_v25 = vmul.f32 %v1091_v55, %v851_v42 }
 0x152   : > { %v807_v31 = vpop.permute.xlu0 %806 }
 0x153   : > { %v809_v63 = vadd.f32 %v807_v31, %v803_v58  ;;  %v860_v47 = vadd.f32 %v859_v27, %v807_v31  ;;  %v836_v19 = vmul.f32 %v831_v6, %v807_v31 }
 0x155   : > { %v811_v62 = vsel %vm540_vm4, %v809_v63, -inf  ;;  %v861_v13 = vsel %vm540_vm4, %v860_v47, -inf  ;;  %v837_v43 = vsel %vm540_vm4, %v836_v19, 0.0 }
 0x156   : > { %v812_v18 = vrot.slane %v811_v62, 4  ;;  %v862_v23 = vrot.slane %v861_v13, 4  ;;  %v838_v57 = vrot.slane %v837_v43, 4 }
 0x158   : > { %v813_v11 = vmax.f32 %v811_v62, %v812_v18  ;;  %v863_v0 = vmax.f32 %v861_v13, %v862_v23  ;;  %v839_v21 = vadd.f32 %v838_v57, %v837_v43 }
 0x15a   : > { %v814_v1 = vrot.slane %v813_v11, 2  ;;  %v864_v2 = vrot.slane %v863_v0, 2  ;;  %v840_v32 = vrot.slane %v839_v21, 2 }
 0x15c   : > { %v815_v4 = vmax.f32 %v813_v11, %v814_v1  ;;  %v865_v5 = vmax.f32 %v863_v0, %v864_v2  ;;  %v841_v51 = vadd.f32 %v840_v32, %v839_v21 }
 0x15e   : > { %v816_v8 = vrot.slane %v815_v4, 1  ;;  %v866_v9 = vrot.slane %v865_v5, 1  ;;  %v842_v56 = vrot.slane %v841_v51, 1 }
 0x160   : > { %v817_v15 = vmax.f32 %v815_v4, %v816_v8  ;;  %v867_v37 = vmax.f32 %v865_v5, %v866_v9  ;;  %v843_v22 = vadd.f32 %v842_v56, %v841_v51 }
 0x162   : > { %v818_v52 = vsub.f32 %v809_v63, %v817_v15  ;;  %vm868_vm5 = vcmp.eq.f32.partialorder %v860_v47, %v867_v37  ;;  %881 = vst.msk [vmem:[#allocation12] sm:$0x1] %vm698_vm12, %v867_v37  ;;  %v853_v61 = vadd.f32 %v852_v59, %v843_v22 }
 0x163   : > { %v869_v33 = vsel %vm868_vm5, %v1437_v10, 7 }
 0x164   : > { %v819_v12 = vmul.f32 1.442695, %v818_v52  ;;  %v870_v26 = vsel %vm540_vm4, %v869_v33, 2147483647  ;;  %v855_v41 = vadd.f32 %v854_v25, %v853_v61 }
 0x165   : > { %v871_v44 = vrot.slane %v870_v26, 4 }
 0x166   : > { %1184 = vpow2.f32 %v819_v12 }
 0x167   : > { %vm872_vm6 = vcmp.lt.s32.totalorder %v870_v26, %v871_v44 }
 0x168   : > { %v873_v3 = vsel %vm872_vm6, %v870_v26, %v871_v44 }
 0x169   : > { %v874_v53 = vrot.slane %v873_v3, 2 }
 0x16b   : > { %vm875_vm7 = vcmp.lt.s32.totalorder %v873_v3, %v874_v53 }
 0x16c   : > { %v1185_v39 = vpop.eup %1184  ;;  %v876_v38 = vsel %vm875_vm7, %v873_v3, %v874_v53 }
 0x16d   : > { %v821_v10 = vsel %vm540_vm4, %v1185_v39, 0.0  ;;  %v877_v14 = vrot.slane %v876_v38, 1 }
 0x16e   : > { %v822_v40 = vrot.slane %v821_v10, 4 }
 0x16f   : > { %vm878_vm8 = vcmp.lt.s32.totalorder %v876_v38, %v877_v14 }
 0x170   : > { %v823_v35 = vadd.f32 %v822_v40, %v821_v10  ;;  %v879_v34 = vsel %vm878_vm8, %v876_v38, %v877_v14 }
 0x171   : > { %880 = vst.msk [vmem:[#allocation10] sm:$0x1] %vm698_vm12, %v879_v34 }
 0x172   : > { %v824_v49 = vrot.slane %v823_v35, 2 }
 0x174   : > { %v825_v20 = vadd.f32 %v824_v49, %v823_v35 }
 0x176   : > { %v826_v50 = vrot.slane %v825_v20, 1 }
 0x178   : > { %v827_v48 = vadd.f32 %v826_v50, %v825_v20 }
 0x17a   : > { %1186 = vlog2.f32 %v827_v48 }
 0x180   : > { %v1187_v29 = vpop.eup %1186 }
 0x181   : > { %v829_v17 = vmul.f32 0.6931472, %v1187_v29 }
 0x183   : > { %v830_v60 = vadd.f32 %v829_v17, %v817_v15 }
 0x185   : > { %v856_v16 = vsub.f32 %v830_v60, %v855_v41 }
 0x187   : > { %858 = vst.msk [vmem:[#allocation8] sm:$0x1] %vm698_vm12, %v856_v16 }
 0x188 PF: > { %p1812_p10 = scmp.eq.s32.totalorder %s1074_s30, 1  ;;  %s1319_s10 = smov [#allocation10]  }
 0x189   : > { %s914_s13 = sshll.u32 %s1319_s10, 4  ;;  %s916_s23 = sshll.u32 %s1855_s7, 4  ;;  %s915_s13 = int_to_ptr.vmem [resolvable:$true] %s914_s13  ;;  %s917_s23 = int_to_ptr.hbm [resolvable:$true] %s916_s23 }
 0x18a   : > { %1103 = dma.vmem_to_hbm [thread:$0]  (%p1812_p10), %s915_s13, 16, %s917_s23, [#allocation11]  }
 0x18b   : > { %s1320_s26 = smov [#allocation8]   ;;  %s899_s18 = sshll.u32 %s1853_s5, 4  ;;  %s900_s18 = int_to_ptr.hbm [resolvable:$true] %s899_s18 }
 0x18c   : > { %s897_s11 = sshll.u32 %s1320_s26, 4  ;;  %s929_s22 = sshll.u32 %s1856_s8, 4  ;;  %s898_s11 = int_to_ptr.vmem [resolvable:$true] %s897_s11  ;;  %s930_s22 = int_to_ptr.hbm [resolvable:$true] %s929_s22 }
 0x18d   : > { %1101 = dma.vmem_to_hbm [thread:$0]  (%p1812_p10), %s898_s11, 16, %s900_s18, [#allocation9]  }
 0x18e   : > { %s1321_s24 = smov [#allocation12]  }
 0x18f   : > { %s927_s25 = sshll.u32 %s1321_s24, 4  ;;  %s928_s25 = int_to_ptr.vmem [resolvable:$true] %s927_s25 }
 0x190   : > { %1105 = dma.vmem_to_hbm [thread:$0]  (%p1812_p10), %s928_s25, 16, %s930_s22, [#allocation11]  }
 0x191   : > { %1289 = dma.done.wait (%p1812_p10), [#allocation9], 16  }
 0x192   : > { %1291 = vsyncadd (%p1812_p10), [#allocation9], 4294967280 }
 0x193   : > { %1293 = dma.done.wait (%p1812_p10), [#allocation11], 32  }
 0x194   : > { %1295 = vsyncadd (%p1812_p10), [#allocation11], 4294967264 }
 0x195 PF: > { %s21_s29 = sadd.s32 1, %s1306_s29   ;;  %s1858_s27 = smov %s1302_s28 }
 0x196   : > { %p18_p11 = scmp.ge.s32.totalorder %s21_s29, 4   ;;  %s1859_s28 = smov %s1861_s9 }
 0x198   :  { %20 = sbr.rel (!%p18_p11) target bundleno = 3 (0x3), region = 136 }
 0x19d   :  { %964 = vsyncpa [#allocation9], 1 }
 0x19e   :  { %966 = vsyncpa [#allocation9 + $0x1], 1 }
 0x19f   :  { %967 = vsyncpa [#allocation11], 1 }

</bundles_post_ra>
